<compile_context>
chip_gen: v7x
topology: tpu7x:2x2x1
jax: 0.10.0
libtpu: 0.0.40
codegen_flags: <defaults>
</compile_context>

<pallas_src>
import jax
import jax.numpy as jnp
from jax import lax
from jax.experimental import pallas as pl
from jax.experimental.pallas import tpu as pltpu

LANE = 128            # TPU lane width: table last dim pre-padded to a multiple of this
MAX_TOK_BLOCK = 512   # upper bound on tokens gathered per grid step
ONEHOT_MAX_V = 4096   # one-hot MXU path only for vocabularies up to this size
GATHER_DEPTH = 8      # row DMAs kept in flight in the HBM-gather path
HEADROOM = 2 << 20    # VMEM slack left for compiler scratch / semaphores


def _round_up(x, m):
    return (x + m - 1) // m * m


def _vmem_budget_bytes():
    """Per-TensorCore VMEM we allow ourselves, generation aware."""
    try:
        cap = getattr(pltpu.get_tpu_info(), "vmem_capacity_bytes", 64 << 20)
    except Exception:  # query unavailable (e.g. interpret mode)
        cap = 64 << 20
    # 25% headroom, never above ~100 MiB: v5e/v6e (128 MiB) -> 96 MiB, v7x (64 MiB) -> 48 MiB
    return int(min(cap * 3 // 4, 100 << 20))


# --------------------------------------------------------------------------- #
# Path A: small/moderate vocab -> VMEM-resident table, one-hot matmul on MXU.  #
# --------------------------------------------------------------------------- #
def _onehot_embed_kernel(ids_ref, w_ref, out_ref):
    # ids_ref : VMEM (tok_block, 1) int32    token ids for this tile
    # w_ref   : VMEM (V, D_pad)              full table, untiled, resident
    # out_ref : VMEM (tok_block, D_pad)      one dense lane-aligned block store
    tok_block = out_ref.shape[0]
    v = w_ref.shape[0]
    ids = ids_ref[...]                                           # (tok_block, 1)
    cols = lax.broadcasted_iota(jnp.int32, (tok_block, v), 1)    # column ids
    one_hot = (ids == cols).astype(w_ref.dtype)                  # (tok_block, V)
    out_ref[...] = jnp.dot(
        one_hot, w_ref[...], preferred_element_type=jnp.float32
    ).astype(out_ref.dtype)


# --------------------------------------------------------------------------- #
# Path B: large vocab -> table stays in HBM, DMA-gather only the needed rows.  #
# --------------------------------------------------------------------------- #
def _hbm_gather_kernel(ids_ref, w_hbm_ref, out_ref, sem):
    # ids_ref   : SMEM (tok_block,) int32    token ids for this tile
    # w_hbm_ref : HBM  (V, D_pad)            never copied to VMEM in full
    # out_ref   : VMEM (tok_block, D_pad)    rows DMA'd straight into the output tile
    # sem       : DMA semaphores (GATHER_DEPTH,)
    tok_block = out_ref.shape[0]

    def row_copy(t):
        return pltpu.make_async_copy(
            w_hbm_ref.at[ids_ref[t]], out_ref.at[t], sem.at[t % GATHER_DEPTH]
        )

    @pl.loop(0, GATHER_DEPTH)                     # prime GATHER_DEPTH row DMAs
    def _(t):
        row_copy(t).start()

    @pl.loop(GATHER_DEPTH, tok_block)             # steady state: wait oldest, start next
    def _(t):
        row_copy(t - GATHER_DEPTH).wait()
        row_copy(t).start()

    @pl.loop(tok_block - GATHER_DEPTH, tok_block)  # drain remaining copies
    def _(t):
        row_copy(t).wait()


# --------------------------------------------------------------------------- #
# Wrapper                                                                      #
# --------------------------------------------------------------------------- #
def _token_embedding_fwd(x, w_padded, d_out, *, force_hbm_gather=False):
    batch, seq = x.shape
    v, d_pad = w_padded.shape
    n = batch * seq
    itemsize = w_padded.dtype.itemsize
    budget = _vmem_budget_bytes()

    # ---- path selection (static: shapes / dtypes only) ----------------------
    table_bytes = v * d_pad * itemsize
    use_onehot = (
        not force_hbm_gather
        and v <= ONEHOT_MAX_V
        and table_bytes + 8 * (2 * d_pad * itemsize + 4 * v) + HEADROOM <= budget
    )

    # ---- token tile size from the remaining VMEM budget ---------------------
    if use_onehot:
        per_tok = 2 * d_pad * itemsize + 4 * v + 8   # out dbl-buffer + one-hot row + id
        avail = budget - table_bytes - HEADROOM
    else:
        per_tok = 2 * d_pad * itemsize + 8           # out dbl-buffer + id
        avail = budget - HEADROOM
    tok_block_max = int(max(8, min(MAX_TOK_BLOCK, avail // per_tok) // 8 * 8))

    n8 = _round_up(n, 8)
    tok_block = min(tok_block_max, n8)
    if n8 % tok_block:
        # prefer a (not-too-small) divisor of the 8-rounded token count so the
        # padded tail -- and the post-call slice copy it forces -- disappears
        for cand in range(tok_block - 8, 63, -8):
            if n8 % cand == 0:
                tok_block = cand
                break
    n_pad = _round_up(n, tok_block)
    steps = n_pad // tok_block

    # Safety clamp: PyTorch raises on out-of-range ids; here we just never read OOB.
    ids = jnp.clip(x.reshape(n).astype(jnp.int32), 0, v - 1)
    if n_pad != n:
        ids = jnp.pad(ids, (0, n_pad - n))   # padded slots gather row 0, sliced off below

    params = pltpu.CompilerParams(
        dimension_semantics=("parallel",),   # token tiles are independent
        vmem_limit_bytes=budget,
    )
    out_shape = jax.ShapeDtypeStruct((n_pad, d_pad), w_padded.dtype)

    if use_onehot:
        out = pl.pallas_call(
            _onehot_embed_kernel,
            out_shape=out_shape,
            grid_spec=pltpu.PrefetchScalarGridSpec(
                num_scalar_prefetch=0,
                grid=(steps,),
                in_specs=[
                    pl.BlockSpec((tok_block, 1), lambda i: (i, 0)),
                    # whole table, untiled and VMEM-resident (single copy,
                    # not double-buffered per step)
                    pl.BlockSpec(memory_space=pltpu.MemorySpace.VMEM),
                ],
                out_specs=pl.BlockSpec((tok_block, d_pad), lambda i: (i, 0)),
            ),
            compiler_params=params,
        )(ids.reshape(n_pad, 1), w_padded)
    else:
        out = pl.pallas_call(
            _hbm_gather_kernel,
            out_shape=out_shape,
            grid_spec=pltpu.PrefetchScalarGridSpec(
                num_scalar_prefetch=0,
                grid=(steps,),
                in_specs=[
                    pl.BlockSpec((tok_block,), lambda i: (i,),
                                 memory_space=pltpu.MemorySpace.SMEM),
                    pl.BlockSpec(memory_space=pl.ANY),   # table stays in HBM
                ],
                out_specs=pl.BlockSpec((tok_block, d_pad), lambda i: (i, 0)),
                scratch_shapes=[pltpu.SemaphoreType.DMA((GATHER_DEPTH,))],
            ),
            compiler_params=params,
        )(ids, w_padded)

    if n_pad != n or d_pad != d_out:
        out = out[:n, :d_out]
    return out.reshape(batch, seq, d_out)


class TokenEmbedding:
    """Forward-only port of bert_pytorch TokenEmbedding (nn.Embedding w/ padding_idx)."""

    def __init__(self, weight, padding_idx=None):
        v, d = weight.shape
        self.num_embeddings = v
        self.embedding_dim = d
        self.padding_idx = padding_idx
        weight = jnp.asarray(weight)
        if padding_idx is not None:
            # nn.Embedding zeroes the padding row at init; forward is then a plain gather.
            weight = weight.at[padding_idx].set(0)
        d_pad = _round_up(d, LANE)
        if d_pad != d:
            # lane-dense table padding done ONCE at init, not per forward call
            weight = jnp.pad(weight, ((0, 0), (0, d_pad - d)))
        self._w_padded = weight

    def __call__(self, x, *, force_hbm_gather=False):
        return _token_embedding_fwd(
            x, self._w_padded, self.embedding_dim, force_hbm_gather=force_hbm_gather
        )


if __name__ == "__main__":
    num_embeddings = 64
    embedding_dim = 32
    padding_idx = 0
    batch, seq = 2, 8

    key = jax.random.PRNGKey(0)
    k_w, k_x = jax.random.split(key)

    weight = jax.random.normal(k_w, (num_embeddings, embedding_dim), dtype=jnp.float32)
    x = jax.random.randint(k_x, (batch, seq), 0, num_embeddings, dtype=jnp.int32)
    x = x.at[0, 0].set(padding_idx)   # deterministic padding_idx token

    emb = TokenEmbedding(weight, padding_idx=padding_idx)

    # reference: plain JAX gather on the padding-zeroed table
    ref_w = weight.at[padding_idx].set(0.0)
    ref = ref_w[x]

    # Path A: VMEM-resident table + one-hot MXU matmul (auto-selected for small vocab)
    out_a = jax.block_until_ready(emb(x))
    assert out_a.shape == (batch, seq, embedding_dim)
    assert out_a.dtype == jnp.float32
    assert jnp.allclose(out_a, ref), "one-hot path mismatch vs reference embedding lookup"
    assert jnp.allclose(out_a[0, 0], 0.0), "padding_idx row should be zeros"

    # Path B: table kept in HBM, rows DMA-gathered (forced here; auto-selected
    # for large vocabularies / tables that do not fit the VMEM budget)
    out_b = jax.block_until_ready(emb(x, force_hbm_gather=True))
    assert out_b.shape == (batch, seq, embedding_dim)
    assert jnp.allclose(out_b, ref), "HBM-gather path mismatch vs reference embedding lookup"
    assert jnp.allclose(out_b[0, 0], 0.0), "padding_idx row should be zeros"

    print("KERNEL_OK")
</pallas_src>

<mosaic_0001>
module attributes {stable_mosaic.version = 11 : i64} {
  func.func @_onehot_embed_kernel(%arg0: i32, %arg1: memref<16x1xi32, #tpu.memory_space<vmem>>, %arg2: memref<64x128xf32, #tpu.memory_space<vmem>>, %arg3: memref<16x128xf32, #tpu.memory_space<vmem>>) attributes {dimension_semantics = [#tpu.dimension_semantics<parallel>], iteration_bounds = array<i64: 1>, scalar_prefetch = 0 : i64, scratch_operands = 0 : i64, tpu.core_type = #tpu.core_type<tc>, window_params = [{transform_indices = @transform_0, window_bounds = array<i64: 16, 1>}, {pipeline_mode = #tpu.pipeline_mode<synchronous>, transform_indices = @transform_1, window_bounds = array<i64: 64, 128>}, {transform_indices = @transform_2, window_bounds = array<i64: 16, 128>}]} {
    %c0 = arith.constant 0 : index
    %c0_0 = arith.constant 0 : index
    %0 = vector.load %arg1[%c0, %c0_0] : memref<16x1xi32, #tpu.memory_space<vmem>>, vector<16x1xi32>
    %1 = tpu.iota {dimensions = array<i32: 1>} : vector<16x64xi32>
    %2 = vector.broadcast %0 : vector<16x1xi32> to vector<16x64xi32>
    %3 = arith.cmpi eq, %2, %1 : vector<16x64xi32>
    %4 = arith.extui %3 : vector<16x64xi1> to vector<16x64xi32>
    %5 = arith.sitofp %4 : vector<16x64xi32> to vector<16x64xf32>
    %c0_1 = arith.constant 0 : index
    %c0_2 = arith.constant 0 : index
    %6 = vector.load %arg2[%c0_1, %c0_2] : memref<64x128xf32, #tpu.memory_space<vmem>>, vector<64x128xf32>
    %cst = arith.constant dense<0.000000e+00> : vector<16x128xf32>
    %7 = tpu.matmul %5, %6, %cst {dimension_numbers = #tpu.dot_dimension_numbers<[1], [0], [0], [1], [0, 0, 1, 1], [], []>} : vector<16x64xf32>, vector<64x128xf32>, vector<16x128xf32> -> vector<16x128xf32>
    %c0_3 = arith.constant 0 : index
    %c0_4 = arith.constant 0 : index
    %8 = vector.load %arg3[%c0_3, %c0_4] : memref<16x128xf32, #tpu.memory_space<vmem>>, vector<16x128xf32>
    tpu.vector_store %arg3[%c0_3, %c0_4], %7 {strides = array<i32>} : memref<16x128xf32, #tpu.memory_space<vmem>>, vector<16x128xf32>,
    return
  }
  func.func @transform_0(%arg0: i32) -> (i32, i32) {
    %c0_i32 = arith.constant 0 : i32
    %c0_i32_0 = arith.constant 0 : i32
    return %arg0, %c0_i32 : i32, i32
  }
  func.func @transform_1(%arg0: i32) -> (i32, i32) {
    %c0_i32 = arith.constant 0 : i32
    %c0_i32_0 = arith.constant 0 : i32
    %c0_i32_1 = arith.constant 0 : i32
    return %c0_i32, %c0_i32_0 : i32, i32
  }
  func.func @transform_2(%arg0: i32) -> (i32, i32) {
    %c0_i32 = arith.constant 0 : i32
    %c0_i32_0 = arith.constant 0 : i32
    return %arg0, %c0_i32 : i32, i32
  }
}

</mosaic_0001>

<bundles_post_ra>
// kernel: tpu_custom_call.1
= control target key start
LH: loop header
LB: loop body
LE: loop exit
PB: predicated region body
PF: predicated region fallthrough
CT: control target
= control target key end

     0   :  { %7 = vsyncpa [#allocation3], 0  ;;  %s312_s0 = inlined_call_operand.vmem [shape: s32[16,1], index: 0, kind: input, shape index: {}]   ;;  %s313_s1 = inlined_call_operand.hbm [shape: f32[64,128], index: 1, kind: input, shape index: {}]   ;;  %s314_s2 = inlined_call_operand.hbm [shape: f32[16,128], index: 2, kind: output, shape index: {}]  }
   0x1   :  { %8 = vsyncpa [#allocation4], 0  ;;  %s255_s9 = smov [#allocation2]   ;;  %s207_s13 = scalar_lea.hbm %s313_s1, 1024 }
   0x2   :  { %s16_s10 = sshll.u32 %s255_s9, 4  ;;  %p208_p0 = scmp.ne.s32.totalorder %s313_s1, %s207_s13  ;;  %s17_s10 = int_to_ptr.vmem [resolvable:$true] %s16_s10 }
   0x3   :  { %p211_p1 = scmp.lt.u32.totalorder %s207_s13, %s313_s1 }
   0x5   :  { %p213_p2 = pnand %p211_p1, %p208_p0 }
   0x7   :  { %216 = shalt.err (!%p213_p2)
}
   0x8   :  { %s217_s18 = scalar_lea.vmem %s17_s10, 1024  ;;  %p222_p4 = scmp.lt.s32.totalorder %s17_s10, %s17_s10 }
   0x9   :  { %p218_p3 = scmp.ne.s32.totalorder %s17_s10, %s217_s18  ;;  %p223_p5 = scmp.lt.s32.totalorder %s217_s18, %s217_s18 }
   0xb   :  { %p224_p6 = por %p223_p5, %p222_p4 }
   0xd   :  { %p225_p7 = pnand %p224_p6, %p218_p3 }
   0xf   :  { %228 = shalt.err (!%p225_p7)
}
  0x10   :  { %s256_s19 = smov 128   ;;  %s257_s20 = smov 8  }
  0x11   :  { %22 = dma.hbm_to_vmem [thread:$0]  %s313_s1, 1024, %s17_s10, [#allocation3], %s256_s19, %s256_s19, %s257_s20  }
  0x12   :  { %251 = dma.done.wait [#allocation3], 1024  }
  0x13   :  { %252 = vsyncadd [#allocation3], 4294966272  ;;  %v258_v0 = vmov 0   ;;  %v26_v1 = vld [vmem:[%s312_s0] sm:$0xff]  ;;  %v43_v3 = vld [vmem:[#allocation2 + $0x8] sm:$0xff]  ;;  %v28_v15 = vlaneseq  ;;  %vm50_vm0 = vcmask 523264  }
  0x14   :  { %206 = vset.pattern.permute.xlu0 %v258_v0  ;;  %v42_v2 = vld [vmem:[#allocation2] sm:$0xff]  ;;  %v44_v4 = vld [vmem:[#allocation2 + $0x10] sm:$0xff]  ;;  %v45_v5 = vld [vmem:[#allocation2 + $0x18] sm:$0xff]  ;;  %v259_v18 = vmov 0.0  }
  0x15   :  { %31 = vperm.xlu0 %206, %v26_v1   ;;  %v27_v6 = vld [vmem:[%s312_s0 + $0x8] sm:$0xff]  ;;  %v184_v7 = vpack.c.bf16 %v43_v3, %v42_v2  ;;  %v188_v8 = vpack.c.bf16 %v45_v5, %v44_v4  ;;  %v46_v9 = vld [vmem:[#allocation2 + $0x20] sm:$0xff]  ;;  %v48_v12 = vld [vmem:[#allocation2 + $0x30] sm:$0xff]  ;;  %v29_v16 = vand.u32 127, %v28_v15  ;;  %s260_s0 = smov [#allocation5]  }
  0x16   :  { %v47_v10 = vld [vmem:[#allocation2 + $0x28] sm:$0xff]  ;;  %v49_v13 = vld [vmem:[#allocation2 + $0x38] sm:$0xff]  ;;  %s139_s1 = sshll.u32 %s260_s0, 4  ;;  %s140_s1 = int_to_ptr.vmem [resolvable:$true] %s139_s1 }
  0x17   :  { %185 = vmatprep.subr.bf16.mxu0 %v184_v7  ;;  %v192_v11 = vpack.c.bf16 %v47_v10, %v46_v9  ;;  %v196_v14 = vpack.c.bf16 %v49_v13, %v48_v12  ;;  %s229_s27 = scalar_lea.vmem %s140_s1, 256  ;;  %p234_p9 = scmp.lt.s32.totalorder %s140_s1, %s140_s1 }
  0x18   :  { %187 = vmatpush3.bf16.msra.mxu0 %v184_v7  ;;  %p230_p8 = scmp.ne.s32.totalorder %s140_s1, %s229_s27  ;;  %p235_p10 = scmp.lt.s32.totalorder %s229_s27, %s229_s27 }
  0x19   :  { %34 = vperm.xlu0 %206, %v27_v6   ;;  %189 = vmatprep.subr.bf16.mxu0 %v188_v8 }
  0x1a   :  { %p236_p11 = por %p235_p10, %p234_p9 }
  0x1c   :  { %191 = vmatpush3.bf16.msra.mxu0 %v188_v8  ;;  %p237_p12 = pnand %p236_p11, %p230_p8 }
  0x1d   :  { %193 = vmatprep.subr.bf16.mxu0 %v192_v11 }
  0x20   :  { %195 = vmatpush3.bf16.msra.mxu0 %v192_v11 }
  0x21   :  { %197 = vmatprep.subr.bf16.mxu0 %v196_v14 }
  0x24   :  { %199 = vmatpush3.bf16.msra.mxu0 %v196_v14 }
  0x94   :  { %v32_v17 = vpop.permute.xlu0 %31 }
  0x95   :  { %vm36_vm1 = vcmp.eq.s32.totalorder %v32_v17, %v29_v16 }
  0x96   :  { %v151_v19 = vsel %vm36_vm1, 1.0, %v259_v18 }
  0x97   :  { %181 = vmatprep.mubr.msk.f32.mxu0 %vm50_vm0, %v151_v19 }
  0x98   :  { %v35_v20 = vpop.permute.xlu0 %34 }
  0x99   :  { %vm37_vm2 = vcmp.eq.s32.totalorder %v35_v20, %v29_v16 }
  0x9a   :  { %v152_v21 = vsel %vm37_vm2, 1.0, %v259_v18 }
  0x9b   :  { %182 = vmatmul.mubr.msk.f32.vlgmr.msra.gmra.mrb[0].mxu0 %vm50_vm0, %v152_v21 }
 0x16e   :  { %v183_v22 = vpop.f32.mrb[0].mxu0 }
 0x16f   :  { %133 = vst [vmem:[#allocation5 + $0x8] sm:$0xff] %v183_v22  ;;  %v123_v23 = vpop.f32.mrb[1].mxu0 }
 0x170   :  { %132 = vst [vmem:[#allocation5] sm:$0xff] %v123_v23 }
 0x171   :  { %240 = shalt.err (!%p237_p12)
}
 0x172   :  { %s241_s30 = scalar_lea.hbm %s314_s2, 256 }
 0x173   :  { %p242_p13 = scmp.ne.s32.totalorder %s314_s2, %s241_s30  ;;  %p245_p0 = scmp.lt.u32.totalorder %s241_s30, %s314_s2 }
 0x175   :  { %p247_p1 = pnand %p245_p0, %p242_p13 }
 0x177   :  { %250 = shalt.err (!%p247_p1)
}
 0x178   :  { %145 = dma.vmem_to_hbm [thread:$0]  %s140_s1, 256, %s314_s2, [#allocation4], %s256_s19, %s256_s19, %s257_s20  }
 0x179   :  { %253 = dma.done.wait [#allocation4], 256  }
 0x17a   :  { %254 = vsyncadd [#allocation4], 4294967040 }
 0x17b   :  { %149 = vsyncpa [#allocation3], 1 }
 0x17c   :  { %150 = vsyncpa [#allocation4], 1 }

</bundles_post_ra>
